<compile_context>
chip_gen: v7x
topology: tpu7x:2x2x1
jax: 0.10.0
libtpu: 0.0.40
codegen_flags: <defaults>
</compile_context>

<pallas_src>
import functools
import math

import jax
import jax.numpy as jnp
from jax.experimental import pallas as pl
from jax.experimental.pallas import tpu as pltpu


def _cln_kernel(x_ref, o_ref, *, eps, inv_f, seg, nseg):
    """Normalize one (blk, lane_w) tile of interleaved [re, im] features.

    Lane k belongs to group gid = (k // seg) * 2 + (k % 2):
      * seg  = 2 * num_features (one logical row's interleaved re/im span)
      * nseg = logical rows packed per lane row (1 unless num_features < 64)
      * parity 0 lanes = real plane, parity 1 lanes = imaginary plane.
    Each group is an independent LayerNorm over 1/inv_f elements.
    """
    x = x_ref[...]
    lane = jax.lax.broadcasted_iota(jnp.int32, x.shape, 1)
    if nseg > 1:
        gid = (lane // seg) * 2 + (lane % 2)
    else:
        gid = lane % 2
    ngroups = 2 * nseg

    # Per-group mean, broadcast back onto member lanes via select.
    mean = jnp.zeros_like(x)
    for g in range(ngroups):
        m = gid == g
        mu = jnp.sum(jnp.where(m, x, 0.0), axis=-1, keepdims=True) * inv_f
        mean = jnp.where(m, mu, mean)
    xc = x - mean

    # Per-group biased variance -> reciprocal std (rsqrt on (blk, 1) columns).
    sq = xc * xc
    rstd = jnp.zeros_like(x)
    for g in range(ngroups):
        m = gid == g
        var = jnp.sum(jnp.where(m, sq, 0.0), axis=-1, keepdims=True) * inv_f
        rstd = jnp.where(m, jax.lax.rsqrt(var + eps), rstd)

    o_ref[...] = xc * rstd


_TARGET_BLOCK_BYTES = 2 * 1024 * 1024  # per-array, per-block VMEM budget


@functools.partial(jax.jit, static_argnames=("eps", "row_block"))
def clayernorm(x, eps=1e-5, row_block=None):
    """Complex LayerNorm over the last axis (elementwise_affine=False)."""
    # TODO(synk): elementwise_affine=True (per-plane gamma/beta) would add one
    # broadcast multiply/add in the kernel; the module's default is False.
    orig_shape = x.shape
    feat = int(orig_shape[-1])
    rows = int(math.prod(orig_shape[:-1]))

    # Interleaved [re, im] f32 view.  lax.bitcast_convert_type rejects complex
    # dtypes, so build the (..., feat, 2) pairs with one fused stack instead.
    # (Also silently narrows complex128 inputs to f32 planes, like the module
    # under PyTorch float defaults.)
    xf = jnp.stack([jnp.real(x).astype(jnp.float32),
                    jnp.imag(x).astype(jnp.float32)], axis=-1)

    # Pack g logical rows per 128-wide lane row when the feature span is small
    # so stores stay lane-dense (only when it costs no extra padding pass).
    seg = 2 * feat
    g = 1
    if seg < 128 and 128 % seg == 0:
        cand = 128 // seg
        if cand <= 4 and rows % cand == 0:
            g = cand
    # TODO(synk): feat < 16 (or feat not a multiple of 64) still produces
    # partially masked lane rows; packing those needs many masked reductions.
    nrows = rows // g
    lane_w = seg * g
    xf = xf.reshape(nrows, lane_w)

    # Row-block size from the VMEM budget (multiple of 8 sublanes, or the full
    # row extent for tiny inputs).
    if row_block is None:
        blk = _TARGET_BLOCK_BYTES // (lane_w * 4)
        blk = max(8, min(8192, (blk // 8) * 8))
    else:
        blk = max(8, (int(row_block) // 8) * 8)
    blk = min(blk, nrows)
    if row_block is None and blk == nrows and nrows >= 1024:
        # Keep >= 2 grid steps so ("parallel",) can use both v7x TensorCores.
        blk = ((nrows + 15) // 16) * 8

    grid = (pl.cdiv(nrows, blk),)
    spec = pl.BlockSpec((blk, lane_w), lambda i: (i, 0))

    block_bytes = blk * lane_w * 4
    vmem_limit = int(max(32 << 20, min(10 * block_bytes + (2 << 20), 56 << 20)))

    kernel = functools.partial(_cln_kernel, eps=float(eps),
                               inv_f=float(1.0 / feat),
                               seg=int(seg), nseg=int(g))

    out = pl.pallas_call(
        kernel,
        out_shape=jax.ShapeDtypeStruct((nrows, lane_w), jnp.float32),
        grid_spec=pltpu.PrefetchScalarGridSpec(
            num_scalar_prefetch=0,
            grid=grid,
            in_specs=[spec],
            out_specs=spec,
        ),
        compiler_params=pltpu.CompilerParams(
            dimension_semantics=("parallel",),
            vmem_limit_bytes=vmem_limit),
        cost_estimate=pl.CostEstimate(
            flops=10 * nrows * lane_w,
            transcendentals=2 * rows,
            bytes_accessed=2 * nrows * lane_w * 4),
    )(xf)

    y = out.reshape(orig_shape + (2,))
    return jax.lax.complex(y[..., 0], y[..., 1])


# Pure-JAX reference mirroring the PyTorch semantics (for the self-check).
def _ref_clayernorm(x, eps=1e-5):
    def ln(v):
        mean = v.mean(axis=-1, keepdims=True)
        var = ((v - mean) ** 2).mean(axis=-1, keepdims=True)
        return (v - mean) / jnp.sqrt(var + eps)
    re = ln(jnp.real(x).astype(jnp.float32))
    im = ln(jnp.imag(x).astype(jnp.float32))
    return jax.lax.complex(re, im)


if __name__ == "__main__":
    key = jax.random.PRNGKey(0)
    ks = jax.random.split(key, 6)

    def mkc(kr, ki, shape):
        return (jax.random.normal(kr, shape, jnp.float32)
                + 1j * jax.random.normal(ki, shape, jnp.float32)
                ).astype(jnp.complex64)

    # 1) Lane-dense interleaved path: (seq, batch, num_features) with F = 128.
    x1 = mkc(ks[0], ks[1], (8, 4, 128))
    o1 = clayernorm(x1)
    jax.block_until_ready(o1)
    assert o1.shape == x1.shape and o1.dtype == jnp.complex64
    assert jnp.allclose(o1, _ref_clayernorm(x1), atol=1e-5, rtol=1e-5)

    # 2) Small-feature packed path: F = 32 -> 2 logical rows per 128-lane row.
    x2 = mkc(ks[2], ks[3], (6, 2, 32))
    o2 = clayernorm(x2)
    jax.block_until_ready(o2)
    assert jnp.allclose(o2, _ref_clayernorm(x2), atol=1e-5, rtol=1e-5)

    # 3) Ragged rows + partial edge block (forced small row block).
    x3 = mkc(ks[4], ks[5], (5, 4, 128))
    o3 = clayernorm(x3, row_block=8)          # grid = 3, last block partial
    jax.block_until_ready(o3)
    assert jnp.allclose(o3, _ref_clayernorm(x3), atol=1e-5, rtol=1e-5)

    # 4) F = 32 with an odd row count -> packing disabled fallback path.
    x4 = mkc(ks[0], ks[2], (5, 3, 32))
    o4 = clayernorm(x4)
    jax.block_until_ready(o4)
    assert jnp.allclose(o4, _ref_clayernorm(x4), atol=1e-5, rtol=1e-5)

    print("KERNEL_OK")
</pallas_src>

<mosaic_0001>
module attributes {stable_mosaic.version = 11 : i64} {
  func.func @_cln_kernel(%arg0: i32, %arg1: memref<32x256xf32, #tpu.memory_space<vmem>>, %arg2: memref<32x256xf32, #tpu.memory_space<vmem>>) attributes {dimension_semantics = [#tpu.dimension_semantics<parallel>], iteration_bounds = array<i64: 1>, scalar_prefetch = 0 : i64, scratch_operands = 0 : i64, tpu.core_type = #tpu.core_type<tc>, window_params = [{transform_indices = @transform_0, window_bounds = array<i64: 32, 256>}, {transform_indices = @transform_1, window_bounds = array<i64: 32, 256>}]} {
    %c0 = arith.constant 0 : index
    %c0_0 = arith.constant 0 : index
    %0 = vector.load %arg1[%c0, %c0_0] : memref<32x256xf32, #tpu.memory_space<vmem>>, vector<32x256xf32>
    %1 = tpu.iota {dimensions = array<i32: 1>} : vector<32x256xi32>
    %c2_i32 = arith.constant 2 : i32
    %c0_i32 = arith.constant 0 : i32
    %2 = arith.cmpi eq, %c2_i32, %c0_i32 : i32
    %c1_i32 = arith.constant 1 : i32
    %3 = arith.select %2, %c1_i32, %c2_i32 : i32
    %4 = vector.broadcast %3 : i32 to vector<32x256xi32>
    %5 = arith.remsi %1, %4 : vector<32x256xi32>
    %c0_i32_1 = arith.constant 0 : i32
    %6 = vector.broadcast %c0_i32_1 : i32 to vector<32x256xi32>
    %7 = arith.cmpi ne, %5, %6 : vector<32x256xi32>
    %c0_i32_2 = arith.constant 0 : i32
    %8 = vector.broadcast %c0_i32_2 : i32 to vector<32x256xi32>
    %9 = arith.cmpi slt, %5, %8 : vector<32x256xi32>
    %c0_i32_3 = arith.constant 0 : i32
    %10 = arith.cmpi slt, %3, %c0_i32_3 : i32
    %11 = vector.broadcast %10 : i1 to vector<32x256xi1>
    %12 = vector.broadcast %11 : vector<32x256xi1> to vector<32x256xi1>
    %13 = arith.xori %9, %12 : vector<32x256xi1>
    %14 = arith.andi %13, %7 : vector<32x256xi1>
    %15 = vector.broadcast %3 : i32 to vector<32x256xi32>
    %16 = arith.addi %5, %15 : vector<32x256xi32>
    %17 = arith.select %14, %16, %5 : vector<32x256xi1>, vector<32x256xi32>
    %cst = arith.constant 0.000000e+00 : f32
    %18 = vector.broadcast %cst : f32 to vector<32x256xf32>
    %c0_i32_4 = arith.constant 0 : i32
    %19 = vector.broadcast %c0_i32_4 : i32 to vector<32x256xi32>
    %20 = arith.cmpi eq, %17, %19 : vector<32x256xi32>
    %cst_5 = arith.constant 0.000000e+00 : f32
    %21 = vector.broadcast %cst_5 : f32 to vector<32x256xf32>
    %22 = arith.select %20, %0, %21 : vector<32x256xi1>, vector<32x256xf32>
    %cst_6 = arith.constant dense<0.000000e+00> : vector<32xf32>
    %23 = vector.multi_reduction <add>, %22, %cst_6 [1] : vector<32x256xf32> to vector<32xf32>
    %24 = vector.shape_cast %23 : vector<32xf32> to vector<32x1xf32>
    %cst_7 = arith.constant 7.812500e-03 : f32
    %25 = vector.broadcast %cst_7 : f32 to vector<32x1xf32>
    %26 = arith.mulf %24, %25 : vector<32x1xf32>
    %27 = vector.shape_cast %26 : vector<32x1xf32> to vector<32x1xf32>
    %28 = vector.broadcast %27 : vector<32x1xf32> to vector<32x256xf32>
    %29 = arith.select %20, %28, %18 : vector<32x256xi1>, vector<32x256xf32>
    %c1_i32_8 = arith.constant 1 : i32
    %30 = vector.broadcast %c1_i32_8 : i32 to vector<32x256xi32>
    %31 = arith.cmpi eq, %17, %30 : vector<32x256xi32>
    %cst_9 = arith.constant 0.000000e+00 : f32
    %32 = vector.broadcast %cst_9 : f32 to vector<32x256xf32>
    %33 = arith.select %31, %0, %32 : vector<32x256xi1>, vector<32x256xf32>
    %cst_10 = arith.constant dense<0.000000e+00> : vector<32xf32>
    %34 = vector.multi_reduction <add>, %33, %cst_10 [1] : vector<32x256xf32> to vector<32xf32>
    %35 = vector.shape_cast %34 : vector<32xf32> to vector<32x1xf32>
    %cst_11 = arith.constant 7.812500e-03 : f32
    %36 = vector.broadcast %cst_11 : f32 to vector<32x1xf32>
    %37 = arith.mulf %35, %36 : vector<32x1xf32>
    %38 = vector.shape_cast %37 : vector<32x1xf32> to vector<32x1xf32>
    %39 = vector.broadcast %38 : vector<32x1xf32> to vector<32x256xf32>
    %40 = arith.select %31, %39, %29 : vector<32x256xi1>, vector<32x256xf32>
    %41 = arith.subf %0, %40 : vector<32x256xf32>
    %42 = arith.mulf %41, %41 : vector<32x256xf32>
    %cst_12 = arith.constant 0.000000e+00 : f32
    %43 = vector.broadcast %cst_12 : f32 to vector<32x256xf32>
    %c0_i32_13 = arith.constant 0 : i32
    %44 = vector.broadcast %c0_i32_13 : i32 to vector<32x256xi32>
    %45 = arith.cmpi eq, %17, %44 : vector<32x256xi32>
    %cst_14 = arith.constant 0.000000e+00 : f32
    %46 = vector.broadcast %cst_14 : f32 to vector<32x256xf32>
    %47 = arith.select %45, %42, %46 : vector<32x256xi1>, vector<32x256xf32>
    %cst_15 = arith.constant dense<0.000000e+00> : vector<32xf32>
    %48 = vector.multi_reduction <add>, %47, %cst_15 [1] : vector<32x256xf32> to vector<32xf32>
    %49 = vector.shape_cast %48 : vector<32xf32> to vector<32x1xf32>
    %cst_16 = arith.constant 7.812500e-03 : f32
    %50 = vector.broadcast %cst_16 : f32 to vector<32x1xf32>
    %51 = arith.mulf %49, %50 : vector<32x1xf32>
    %cst_17 = arith.constant 9.99999974E-6 : f32
    %52 = vector.broadcast %cst_17 : f32 to vector<32x1xf32>
    %53 = arith.addf %51, %52 : vector<32x1xf32>
    %54 = math.rsqrt %53 : vector<32x1xf32>
    %55 = vector.shape_cast %54 : vector<32x1xf32> to vector<32x1xf32>
    %56 = vector.broadcast %55 : vector<32x1xf32> to vector<32x256xf32>
    %57 = arith.select %45, %56, %43 : vector<32x256xi1>, vector<32x256xf32>
    %c1_i32_18 = arith.constant 1 : i32
    %58 = vector.broadcast %c1_i32_18 : i32 to vector<32x256xi32>
    %59 = arith.cmpi eq, %17, %58 : vector<32x256xi32>
    %cst_19 = arith.constant 0.000000e+00 : f32
    %60 = vector.broadcast %cst_19 : f32 to vector<32x256xf32>
    %61 = arith.select %59, %42, %60 : vector<32x256xi1>, vector<32x256xf32>
    %cst_20 = arith.constant dense<0.000000e+00> : vector<32xf32>
    %62 = vector.multi_reduction <add>, %61, %cst_20 [1] : vector<32x256xf32> to vector<32xf32>
    %63 = vector.shape_cast %62 : vector<32xf32> to vector<32x1xf32>
    %cst_21 = arith.constant 7.812500e-03 : f32
    %64 = vector.broadcast %cst_21 : f32 to vector<32x1xf32>
    %65 = arith.mulf %63, %64 : vector<32x1xf32>
    %cst_22 = arith.constant 9.99999974E-6 : f32
    %66 = vector.broadcast %cst_22 : f32 to vector<32x1xf32>
    %67 = arith.addf %65, %66 : vector<32x1xf32>
    %68 = math.rsqrt %67 : vector<32x1xf32>
    %69 = vector.shape_cast %68 : vector<32x1xf32> to vector<32x1xf32>
    %70 = vector.broadcast %69 : vector<32x1xf32> to vector<32x256xf32>
    %71 = arith.select %59, %70, %57 : vector<32x256xi1>, vector<32x256xf32>
    %72 = arith.mulf %41, %71 : vector<32x256xf32>
    %c0_23 = arith.constant 0 : index
    %c0_24 = arith.constant 0 : index
    %73 = vector.load %arg2[%c0_23, %c0_24] : memref<32x256xf32, #tpu.memory_space<vmem>>, vector<32x256xf32>
    tpu.vector_store %arg2[%c0_23, %c0_24], %72 {strides = array<i32>} : memref<32x256xf32, #tpu.memory_space<vmem>>, vector<32x256xf32>,
    return
  }
  func.func @transform_0(%arg0: i32) -> (i32, i32) {
    %c0_i32 = arith.constant 0 : i32
    %c0_i32_0 = arith.constant 0 : i32
    return %arg0, %c0_i32 : i32, i32
  }
  func.func @transform_1(%arg0: i32) -> (i32, i32) {
    %c0_i32 = arith.constant 0 : i32
    %c0_i32_0 = arith.constant 0 : i32
    return %arg0, %c0_i32 : i32, i32
  }
}

</mosaic_0001>

<bundles_post_ra>
// kernel: custom-call
= control target key start
LH: loop header
LB: loop body
LE: loop exit
PB: predicated region body
PF: predicated region fallthrough
CT: control target
= control target key end

     0   :  { %2 = vsyncpa [#allocation0], 0  ;;  %s61_s0 = inlined_call_operand.hbm [shape: c64[8,4,128], index: 0, kind: input, shape index: {}]   ;;  %s62_s1 = inlined_call_operand.vmem [shape: f32[8,4,128], index: 1, kind: output, shape index: {}]  }
   0x1   :  { %s3_s8 = sshll.u32 %s62_s1, 4  ;;  %s9_s11 = scalar_lea.hbm %s61_s0, 512  ;;  %s4_s8 = int_to_ptr.vmem [resolvable:$true] %s3_s8 }
   0x2   :  { %p10_p0 = scmp.ne.s32.totalorder %s61_s0, %s9_s11  ;;  %s11_s16 = scalar_lea.hbm %s61_s0, 1024 }
   0x3   :  { %p12_p1 = scmp.lt.u32.totalorder %s11_s16, %s9_s11  ;;  %p13_p2 = scmp.lt.u32.totalorder %s9_s11, %s61_s0 }
   0x5   :  { %p14_p3 = por %p13_p2, %p12_p1 }
   0x7   :  { %p15_p4 = pnand %p14_p3, %p10_p0 }
   0x9   :  { %18 = shalt.err (!%p15_p4)  }
   0xa   :  { %s19_s1 = scalar_lea.vmem %s4_s8, 512  ;;  %p24_p6 = scmp.lt.s32.totalorder %s4_s8, %s4_s8 }
   0xb   :  { %p20_p5 = scmp.ne.s32.totalorder %s4_s8, %s19_s1  ;;  %p25_p7 = scmp.lt.s32.totalorder %s19_s1, %s19_s1 }
   0xd   :  { %p26_p8 = por %p25_p7, %p24_p6 }
   0xf   :  { %p27_p9 = pnand %p26_p8, %p20_p5 }
  0x11   :  { %30 = shalt.err (!%p27_p9)  }
  0x12   :  { %6 = dma.hbm_to_vmem [thread:$0]  %s61_s0, 512, %s4_s8, [#allocation0] }
  0x13   :  { %31 = dma.done.wait [#allocation0], 512  }
  0x14   :  { %32 = vsyncadd [#allocation0], 4294966784 }
  0x15   :  { %8 = vsyncpa [#allocation0], 1 }

// kernel: custom-call.1
= control target key start
LH: loop header
LB: loop body
LE: loop exit
PB: predicated region body
PF: predicated region fallthrough
CT: control target
= control target key end

     0   :  { %s59_s0 = inlined_call_operand.hbm [shape: c64[8,4,128], index: 0, kind: input, shape index: {}]   ;;  %s60_s1 = inlined_call_operand.vmem [shape: f32[8,4,128], index: 1, kind: output, shape index: {}]  }
   0x1   :  { %s2_s8 = scalar_lea.hbm %s59_s0, 512 }
   0x2   :  { %3 = vsyncpa [#allocation0], 0  ;;  %s4_s11 = sshll.u32 %s60_s1, 4  ;;  %s34_s14 = scalar_lea.hbm %s59_s0, 1024  ;;  %s5_s11 = int_to_ptr.vmem [resolvable:$true] %s4_s11 }
   0x3   :  { %p11_p0 = scmp.ne.s32.totalorder %s2_s8, %s34_s14  ;;  %p13_p1 = scmp.lt.u32.totalorder %s2_s8, %s59_s0 }
   0x4   :  { %p14_p2 = scmp.lt.u32.totalorder %s34_s14, %s34_s14  ;;  %p16_p4 = scmp.lt.u32.totalorder %s34_s14, %s2_s8 }
   0x6   :  { %p15_p3 = por %p14_p2, %p13_p1 }
   0x8   :  { %p17_p5 = por %p16_p4, %p15_p3 }
   0xa   :  { %p18_p6 = pnand %p17_p5, %p11_p0 }
   0xc   :  { %21 = shalt.err (!%p18_p6)  }
   0xd   :  { %s22_s17 = scalar_lea.vmem %s5_s11, 512  ;;  %p27_p8 = scmp.lt.s32.totalorder %s5_s11, %s5_s11 }
   0xe   :  { %p23_p7 = scmp.ne.s32.totalorder %s5_s11, %s22_s17  ;;  %p28_p9 = scmp.lt.s32.totalorder %s22_s17, %s22_s17 }
  0x10   :  { %p29_p10 = por %p28_p9, %p27_p8 }
  0x12   :  { %p30_p11 = pnand %p29_p10, %p23_p7 }
  0x14   :  { %33 = shalt.err (!%p30_p11)  }
  0x15   :  { %7 = dma.hbm_to_vmem [thread:$0]  %s2_s8, 512, %s5_s11, [#allocation0] }
  0x16   :  { %35 = dma.done.wait [#allocation0], 512  }
  0x17   :  { %36 = vsyncadd [#allocation0], 4294966784 }
  0x18   :  { %9 = vsyncpa [#allocation0], 1 }

// kernel: clayernorm.1
= control target key start
LH: loop header
LB: loop body
LE: loop exit
PB: predicated region body
PF: predicated region fallthrough
CT: control target
= control target key end

     0   :  { %v16_v0 = vlaneseq  ;;  %s520_s0 = inlined_call_operand.vmem [shape: f32[32,256], index: 0, kind: input, shape index: {}]   ;;  %s521_s1 = inlined_call_operand.vmem [shape: f32[32,256], index: 1, kind: output, shape index: {}]  }
   0x1   :  { %v256_v2 = vld [vmem:[%s520_s0 + $0x20] sm:$0xff]  ;;  %v266_v6 = vld [vmem:[%s520_s0 + $0x28] sm:$0xff]  ;;  %v271_v7 = vld [vmem:[%s520_s0 + $0x30] sm:$0xff] }
   0x2   :  { %v17_v1 = vand.u32 127, %v16_v0  ;;  %v261_v5 = vld [vmem:[%s520_s0] sm:$0xff]  ;;  %v276_v8 = vld [vmem:[%s520_s0 + $0x10] sm:$0xff]  ;;  %v285_v11 = vld [vmem:[%s520_s0 + $0x8] sm:$0xff] }
   0x3   :  { %v290_v12 = vld [vmem:[%s520_s0 + $0x38] sm:$0xff] }
   0x4   :  { %v18_v3 = vadd.s32 128, %v17_v1  ;;  %v23_v4 = vand.u32 1, %v17_v1  ;;  %v11_v13 = vld [vmem:[%s520_s0 + $0x18] sm:$0xff] }
   0x6   :  { %v30_v9 = vand.u32 1, %v18_v3  ;;  %vm278_vm0 = vcmp.eq.s32.totalorder %v23_v4, 0  ;;  %vm322_vm2 = vcmp.eq.s32.totalorder %v23_v4, 1 }
   0x7   :  { %v49_v14 = vsel %vm278_vm0, %v256_v2, 0.0  ;;  %v45_v15 = vsel %vm278_vm0, %v261_v5, 0.0  ;;  %v51_v17 = vsel %vm278_vm0, %v271_v7, 0.0  ;;  %v47_v18 = vsel %vm278_vm0, %v276_v8, 0.0 }
   0x8   :  { %vm301_vm1 = vcmp.eq.s32.totalorder %v30_v9, 0  ;;  %vm326_vm3 = vcmp.eq.s32.totalorder %v30_v9, 1  ;;  %v81_v29 = vsel %vm322_vm2, %v276_v8, 0.0  ;;  %v79_v31 = vsel %vm322_vm2, %v261_v5, 0.0 }
   0x9   :  { %v50_v19 = vsel %vm301_vm1, %v266_v6, 0.0  ;;  %v46_v20 = vsel %vm301_vm1, %v285_v11, 0.0  ;;  %v52_v21 = vsel %vm301_vm1, %v290_v12, 0.0  ;;  %v48_v22 = vsel %vm301_vm1, %v11_v13, 0.0 }
   0xa   :  { %v59_v23 = vadd.f32 %v50_v19, %v49_v14  ;;  %v53_v24 = vadd.f32 %v46_v20, %v45_v15  ;;  %v62_v27 = vadd.f32 %v52_v21, %v51_v17  ;;  %v56_v28 = vadd.f32 %v48_v22, %v47_v18 }
   0xb   :  { %v82_v30 = vsel %vm326_vm3, %v11_v13, 0.0  ;;  %v80_v32 = vsel %vm326_vm3, %v285_v11, 0.0  ;;  %v85_v35 = vsel %vm322_vm2, %v271_v7, 0.0  ;;  %v86_v36 = vsel %vm326_vm3, %v290_v12, 0.0 }
   0xc   :  { %60 = vadd.xlane.f32.xlu1 %v59_v23  ;;  %54 = vadd.xlane.f32.xlu0 %v53_v24  ;;  %v90_v33 = vadd.f32 %v82_v30, %v81_v29  ;;  %v87_v34 = vadd.f32 %v80_v32, %v79_v31  ;;  %v83_v37 = vsel %vm322_vm2, %v256_v2, 0.0  ;;  %v84_v38 = vsel %vm326_vm3, %v266_v6, 0.0 }
   0xd   :  { %v96_v39 = vadd.f32 %v86_v36, %v85_v35  ;;  %v93_v40 = vadd.f32 %v84_v38, %v83_v37 }
  0x10   :  { %63 = vadd.xlane.f32.xlu1 %v62_v27  ;;  %57 = vadd.xlane.f32.xlu0 %v56_v28 }
  0x14   :  { %91 = vadd.xlane.f32.xlu1 %v90_v33  ;;  %88 = vadd.xlane.f32.xlu0 %v87_v34 }
  0x18   :  { %97 = vadd.xlane.f32.xlu1 %v96_v39  ;;  %94 = vadd.xlane.f32.xlu0 %v93_v40 }
  0x99   :  { %v61_v41 = vpop.xlane.xlu1 %60  ;;  %v55_v42 = vpop.xlane.xlu0 %54 }
  0x9a   :  { %v67_v43 = vmul.f32 0.0078125, %v61_v41  ;;  %v65_v46 = vmul.f32 0.0078125, %v55_v42 }
  0x9c   :  { %v73_v48 = vsel %vm278_vm0, %v67_v43, 0.0  ;;  %v74_v51 = vsel %vm301_vm1, %v67_v43, 0.0  ;;  %v69_v55 = vsel %vm278_vm0, %v65_v46, 0.0  ;;  %v70_v56 = vsel %vm301_vm1, %v65_v46, 0.0 }
  0x9d   :  { %v64_v44 = vpop.xlane.xlu1 %63  ;;  %v58_v45 = vpop.xlane.xlu0 %57 }
  0x9e   :  { %v66_v47 = vmul.f32 0.0078125, %v58_v45  ;;  %v68_v52 = vmul.f32 0.0078125, %v64_v44 }
  0xa0   :  { %v71_v57 = vsel %vm278_vm0, %v66_v47, 0.0  ;;  %v72_v58 = vsel %vm301_vm1, %v66_v47, 0.0  ;;  %v75_v14 = vsel %vm278_vm0, %v68_v52, 0.0  ;;  %v76_v15 = vsel %vm301_vm1, %v68_v52, 0.0 }
  0xa1   :  { %v92_v49 = vpop.xlane.xlu1 %91  ;;  %v89_v50 = vpop.xlane.xlu0 %88 }
  0xa2   :  { %v100_v53 = vmul.f32 0.0078125, %v92_v49  ;;  %v99_v54 = vmul.f32 0.0078125, %v89_v50 }
  0xa4   :  { %v105_v59 = vsel %vm322_vm2, %v100_v53, %v71_v57  ;;  %v106_v60 = vsel %vm326_vm3, %v100_v53, %v72_v58  ;;  %v103_v61 = vsel %vm322_vm2, %v99_v54, %v69_v55  ;;  %v104_v62 = vsel %vm326_vm3, %v99_v54, %v70_v56 }
  0xa5   :  { %v374_v63 = vsub.f32 %v276_v8, %v105_v59  ;;  %v376_v0 = vsub.f32 %v11_v13, %v106_v60  ;;  %v379_v1 = vsub.f32 %v261_v5, %v103_v61  ;;  %v382_v3 = vsub.f32 %v285_v11, %v104_v62  ;;  %v98_v4 = vpop.xlane.xlu1 %97  ;;  %v95_v9 = vpop.xlane.xlu0 %94 }
  0xa6   :  { %v102_v17 = vmul.f32 0.0078125, %v98_v4  ;;  %v101_v18 = vmul.f32 0.0078125, %v95_v9 }
  0xa7   :  { %v121_v8 = vmul.f32 %v374_v63, %v374_v63  ;;  %v122_v5 = vmul.f32 %v376_v0, %v376_v0  ;;  %v119_v11 = vmul.f32 %v379_v1, %v379_v1  ;;  %v120_v13 = vmul.f32 %v382_v3, %v382_v3 }
  0xa8   :  { %v109_v19 = vsel %vm322_vm2, %v102_v17, %v75_v14  ;;  %v110_v20 = vsel %vm326_vm3, %v102_v17, %v76_v15  ;;  %v107_v21 = vsel %vm322_vm2, %v101_v18, %v73_v48  ;;  %v108_v22 = vsel %vm326_vm3, %v101_v18, %v74_v51 }
  0xa9   :  { %v405_v23 = vsub.f32 %v271_v7, %v109_v19  ;;  %v408_v24 = vsub.f32 %v290_v12, %v110_v20  ;;  %v411_v27 = vsub.f32 %v256_v2, %v107_v21  ;;  %v414_v28 = vsub.f32 %v266_v6, %v108_v22 }
  0xaa   :  { %v129_v29 = vsel %vm278_vm0, %v121_v8, 0.0  ;;  %v130_v30 = vsel %vm301_vm1, %v122_v5, 0.0  ;;  %v127_v31 = vsel %vm278_vm0, %v119_v11, 0.0  ;;  %v128_v7 = vsel %vm301_vm1, %v120_v13, 0.0 }
  0xab   :  { %v138_v12 = vadd.f32 %v130_v30, %v129_v29  ;;  %v135_v32 = vadd.f32 %v128_v7, %v127_v31  ;;  %v125_v2 = vmul.f32 %v405_v23, %v405_v23  ;;  %v126_v6 = vmul.f32 %v408_v24, %v408_v24 }
  0xac   :  { %v123_v33 = vmul.f32 %v411_v27, %v411_v27  ;;  %v124_v34 = vmul.f32 %v414_v28, %v414_v28  ;;  %v169_v41 = vsel %vm322_vm2, %v121_v8, 0.0  ;;  %v170_v42 = vsel %vm326_vm3, %v122_v5, 0.0 }
  0xad   :  { %139 = vadd.xlane.f32.xlu1 %v138_v12  ;;  %136 = vadd.xlane.f32.xlu0 %v135_v32  ;;  %v133_v35 = vsel %vm278_vm0, %v125_v2, 0.0  ;;  %v134_v36 = vsel %vm301_vm1, %v126_v6, 0.0  ;;  %v167_v43 = vsel %vm322_vm2, %v119_v11, 0.0  ;;  %v168_v44 = vsel %vm326_vm3, %v120_v13, 0.0 }
  0xae   :  { %v144_v37 = vadd.f32 %v134_v36, %v133_v35  ;;  %v131_v38 = vsel %vm278_vm0, %v123_v33, 0.0  ;;  %v132_v39 = vsel %vm301_vm1, %v124_v34, 0.0  ;;  %v178_v45 = vadd.f32 %v170_v42, %v169_v41 }
  0xaf   :  { %v141_v40 = vadd.f32 %v132_v39, %v131_v38  ;;  %v175_v46 = vadd.f32 %v168_v44, %v167_v43  ;;  %v173_v47 = vsel %vm322_vm2, %v125_v2, 0.0  ;;  %v174_v48 = vsel %vm326_vm3, %v126_v6, 0.0 }
  0xb0   :  { %v171_v49 = vsel %vm322_vm2, %v123_v33, 0.0  ;;  %v172_v50 = vsel %vm326_vm3, %v124_v34, 0.0  ;;  %v184_v51 = vadd.f32 %v174_v48, %v173_v47 }
  0xb1   :  { %145 = vadd.xlane.f32.xlu1 %v144_v37  ;;  %142 = vadd.xlane.f32.xlu0 %v141_v40  ;;  %v181_v52 = vadd.f32 %v172_v50, %v171_v49 }
  0xb5   :  { %179 = vadd.xlane.f32.xlu1 %v178_v45  ;;  %176 = vadd.xlane.f32.xlu0 %v175_v46 }
  0xb9   :  { %185 = vadd.xlane.f32.xlu1 %v184_v51  ;;  %182 = vadd.xlane.f32.xlu0 %v181_v52 }
 0x13a   :  { %v140_v53 = vpop.xlane.xlu1 %139  ;;  %v137_v54 = vpop.xlane.xlu0 %136 }
 0x13b   :  { %v148_v55 = vmul.f32 0.0078125, %v140_v53  ;;  %v147_v56 = vmul.f32 0.0078125, %v137_v54 }
 0x13d   :  { %v152_v60 = vadd.f32 1e-05, %v148_v55  ;;  %v151_v61 = vadd.f32 1e-05, %v147_v56 }
 0x13e   :  { %v146_v57 = vpop.xlane.xlu1 %145  ;;  %v143_v58 = vpop.xlane.xlu0 %142 }
 0x13f   :  { %v150_v59 = vmul.f32 0.0078125, %v146_v57  ;;  %v149_v62 = vmul.f32 0.0078125, %v143_v58  ;;  %227 = vrsqrt.f32 %v152_v60 }
 0x140   :  { %229 = vrsqrt.f32 %v151_v61 }
 0x141   :  { %v154_v4 = vadd.f32 1e-05, %v150_v59  ;;  %v153_v18 = vadd.f32 1e-05, %v149_v62 }
 0x142   :  { %v180_v9 = vpop.xlane.xlu1 %179  ;;  %v177_v14 = vpop.xlane.xlu0 %176 }
 0x143   :  { %v188_v15 = vmul.f32 0.0078125, %v180_v9  ;;  %v187_v17 = vmul.f32 0.0078125, %v177_v14  ;;  %231 = vrsqrt.f32 %v154_v4 }
 0x145   :  { %v192_v8 = vadd.f32 1e-05, %v188_v15  ;;  %v191_v5 = vadd.f32 1e-05, %v187_v17 }
 0x146   :  { %v186_v11 = vpop.xlane.xlu1 %185  ;;  %v183_v13 = vpop.xlane.xlu0 %182 }
 0x147   :  { %233 = vrsqrt.f32 %v192_v8  ;;  %v190_v19 = vmul.f32 0.0078125, %v186_v11  ;;  %v189_v20 = vmul.f32 0.0078125, %v183_v13 }
 0x148   :  { %235 = vrsqrt.f32 %v191_v5 }
 0x149   :  { %237 = vrsqrt.f32 %v153_v18  ;;  %v194_v21 = vadd.f32 1e-05, %v190_v19  ;;  %v193_v22 = vadd.f32 1e-05, %v189_v20  ;;  %v228_v29 = vpop.eup %227 }
 0x14a   :  { %v230_v30 = vpop.eup %229  ;;  %v161_v12 = vsel %vm278_vm0, %v228_v29, 0.0  ;;  %v162_v32 = vsel %vm301_vm1, %v228_v29, 0.0 }
 0x14b   :  { %239 = vrsqrt.f32 %v194_v21  ;;  %v159_v6 = vsel %vm278_vm0, %v230_v30, 0.0  ;;  %v160_v33 = vsel %vm301_vm1, %v230_v30, 0.0 }
 0x14c   :  { %241 = vrsqrt.f32 %v193_v22 }
 0x14d   :  { %v232_v31 = vpop.eup %231 }
 0x14e   :  { %v165_v44 = vsel %vm278_vm0, %v232_v31, 0.0  ;;  %v166_v45 = vsel %vm301_vm1, %v232_v31, 0.0 }
 0x151   :  { %v234_v7 = vpop.eup %233 }
 0x152   :  { %v236_v2 = vpop.eup %235  ;;  %v201_v34 = vsel %vm322_vm2, %v234_v7, %v161_v12  ;;  %v202_v35 = vsel %vm326_vm3, %v234_v7, %v162_v32 }
 0x153   :  { %v238_v36 = vpop.eup %237  ;;  %v209_v37 = vmul.f32 %v201_v34, %v374_v63  ;;  %v210_v38 = vmul.f32 %v202_v35, %v376_v0  ;;  %v199_v39 = vsel %vm322_vm2, %v236_v2, %v159_v6  ;;  %v200_v40 = vsel %vm326_vm3, %v236_v2, %v160_v33 }
 0x154   :  { %v207_v41 = vmul.f32 %v199_v39, %v379_v1  ;;  %v208_v42 = vmul.f32 %v200_v40, %v382_v3  ;;  %v163_v0 = vsel %vm278_vm0, %v238_v36, 0.0  ;;  %v164_v1 = vsel %vm301_vm1, %v238_v36, 0.0 }
 0x155   :  { %v240_v43 = vpop.eup %239  ;;  %217 = vst [vmem:[%s521_s1 + $0x10] sm:$0xff] %v209_v37  ;;  %218 = vst [vmem:[%s521_s1 + $0x18] sm:$0xff] %v210_v38 }
 0x156   :  { %v242_v63 = vpop.eup %241  ;;  %215 = vst [vmem:[%s521_s1] sm:$0xff] %v207_v41  ;;  %216 = vst [vmem:[%s521_s1 + $0x8] sm:$0xff] %v208_v42  ;;  %v205_v3 = vsel %vm322_vm2, %v240_v43, %v165_v44  ;;  %v206_v46 = vsel %vm326_vm3, %v240_v43, %v166_v45 }
 0x157   :  { %v213_v10 = vmul.f32 %v205_v3, %v405_v23  ;;  %v214_v47 = vmul.f32 %v206_v46, %v408_v24  ;;  %v203_v16 = vsel %vm322_vm2, %v242_v63, %v163_v0  ;;  %v204_v48 = vsel %vm326_vm3, %v242_v63, %v164_v1 }
 0x158   :  { %v211_v49 = vmul.f32 %v203_v16, %v411_v27  ;;  %v212_v50 = vmul.f32 %v204_v48, %v414_v28 }
 0x159   :  { %221 = vst [vmem:[%s521_s1 + $0x30] sm:$0xff] %v213_v10  ;;  %222 = vst [vmem:[%s521_s1 + $0x38] sm:$0xff] %v214_v47 }
 0x15a   :  { %219 = vst [vmem:[%s521_s1 + $0x20] sm:$0xff] %v211_v49  ;;  %220 = vst [vmem:[%s521_s1 + $0x28] sm:$0xff] %v212_v50 }

// kernel: custom-call.2
= control target key start
LH: loop header
LB: loop body
LE: loop exit
PB: predicated region body
PF: predicated region fallthrough
CT: control target
= control target key end

     0   :  { %s3212_s0 = inlined_call_operand.vmem [shape: f32[8,4,128], index: 0, kind: input, shape index: {}]   ;;  %s3213_s2 = inlined_call_operand.vmem [shape: c64[8,4,128], index: 2, kind: output, shape index: {}]   ;;  %s3214_s1 = inlined_call_operand.vmem [shape: f32[8,4,128], index: 1, kind: input, shape index: {}]  }
   0x1   :  { %v5_v0 = vld [vmem:[%s3212_s0] sm:$0xff]  ;;  %v1152_v1 = vld [vmem:[%s3212_s0 + $0x8] sm:$0xff]  ;;  %v1154_v2 = vld [vmem:[%s3212_s0 + $0x10] sm:$0xff] }
   0x2   :  { %6 = vst [vmem:[%s3213_s2] sm:$0xff] %v5_v0  ;;  %1153 = vst [vmem:[%s3213_s2 + $0x8] sm:$0xff] %v1152_v1  ;;  %v1156_v3 = vld [vmem:[%s3212_s0 + $0x18] sm:$0xff]  ;;  %v1158_v4 = vld [vmem:[%s3212_s0 + $0x20] sm:$0xff] }
   0x3   :  { %1155 = vst [vmem:[%s3213_s2 + $0x10] sm:$0xff] %v1154_v2  ;;  %v1160_v5 = vld [vmem:[%s3212_s0 + $0x28] sm:$0xff]  ;;  %1157 = vst [vmem:[%s3213_s2 + $0x18] sm:$0xff] %v1156_v3  ;;  %v1162_v6 = vld [vmem:[%s3212_s0 + $0x30] sm:$0xff] }
   0x4   :  { %1159 = vst [vmem:[%s3213_s2 + $0x20] sm:$0xff] %v1158_v4  ;;  %1161 = vst [vmem:[%s3213_s2 + $0x28] sm:$0xff] %v1160_v5  ;;  %v1164_v7 = vld [vmem:[%s3212_s0 + $0x38] sm:$0xff]  ;;  %v1166_v8 = vld [vmem:[%s3212_s0 + $0x40] sm:$0xff] }
   0x5   :  { %1163 = vst [vmem:[%s3213_s2 + $0x30] sm:$0xff] %v1162_v6  ;;  %1165 = vst [vmem:[%s3213_s2 + $0x38] sm:$0xff] %v1164_v7  ;;  %v1168_v9 = vld [vmem:[%s3212_s0 + $0x48] sm:$0xff]  ;;  %v1170_v10 = vld [vmem:[%s3212_s0 + $0x50] sm:$0xff] }
   0x6   :  { %1167 = vst [vmem:[%s3213_s2 + $0x40] sm:$0xff] %v1166_v8  ;;  %v1172_v11 = vld [vmem:[%s3212_s0 + $0x58] sm:$0xff]  ;;  %1169 = vst [vmem:[%s3213_s2 + $0x48] sm:$0xff] %v1168_v9  ;;  %v1174_v12 = vld [vmem:[%s3212_s0 + $0x60] sm:$0xff] }
   0x7   :  { %1171 = vst [vmem:[%s3213_s2 + $0x50] sm:$0xff] %v1170_v10  ;;  %1173 = vst [vmem:[%s3213_s2 + $0x58] sm:$0xff] %v1172_v11  ;;  %v1176_v13 = vld [vmem:[%s3212_s0 + $0x68] sm:$0xff]  ;;  %v1178_v14 = vld [vmem:[%s3212_s0 + $0x70] sm:$0xff] }
   0x8   :  { %1175 = vst [vmem:[%s3213_s2 + $0x60] sm:$0xff] %v1174_v12  ;;  %1177 = vst [vmem:[%s3213_s2 + $0x68] sm:$0xff] %v1176_v13  ;;  %v1180_v15 = vld [vmem:[%s3212_s0 + $0x78] sm:$0xff]  ;;  %v1182_v16 = vld [vmem:[%s3212_s0 + $0x80] sm:$0xff] }
   0x9   :  { %1179 = vst [vmem:[%s3213_s2 + $0x70] sm:$0xff] %v1178_v14  ;;  %v1184_v17 = vld [vmem:[%s3212_s0 + $0x88] sm:$0xff]  ;;  %1181 = vst [vmem:[%s3213_s2 + $0x78] sm:$0xff] %v1180_v15  ;;  %v1186_v18 = vld [vmem:[%s3212_s0 + $0x90] sm:$0xff] }
   0xa   :  { %1183 = vst [vmem:[%s3213_s2 + $0x80] sm:$0xff] %v1182_v16  ;;  %1185 = vst [vmem:[%s3213_s2 + $0x88] sm:$0xff] %v1184_v17  ;;  %v1188_v19 = vld [vmem:[%s3212_s0 + $0x98] sm:$0xff]  ;;  %v1190_v20 = vld [vmem:[%s3212_s0 + $0xa0] sm:$0xff] }
   0xb   :  { %1187 = vst [vmem:[%s3213_s2 + $0x90] sm:$0xff] %v1186_v18  ;;  %1189 = vst [vmem:[%s3213_s2 + $0x98] sm:$0xff] %v1188_v19  ;;  %v1192_v21 = vld [vmem:[%s3212_s0 + $0xa8] sm:$0xff]  ;;  %v1194_v22 = vld [vmem:[%s3212_s0 + $0xb0] sm:$0xff] }
   0xc   :  { %1191 = vst [vmem:[%s3213_s2 + $0xa0] sm:$0xff] %v1190_v20  ;;  %v1196_v23 = vld [vmem:[%s3212_s0 + $0xb8] sm:$0xff]  ;;  %1193 = vst [vmem:[%s3213_s2 + $0xa8] sm:$0xff] %v1192_v21  ;;  %v1198_v24 = vld [vmem:[%s3212_s0 + $0xc0] sm:$0xff] }
   0xd   :  { %1195 = vst [vmem:[%s3213_s2 + $0xb0] sm:$0xff] %v1194_v22  ;;  %1197 = vst [vmem:[%s3213_s2 + $0xb8] sm:$0xff] %v1196_v23  ;;  %v1200_v25 = vld [vmem:[%s3212_s0 + $0xc8] sm:$0xff]  ;;  %v1202_v26 = vld [vmem:[%s3212_s0 + $0xd0] sm:$0xff] }
   0xe   :  { %1199 = vst [vmem:[%s3213_s2 + $0xc0] sm:$0xff] %v1198_v24  ;;  %1201 = vst [vmem:[%s3213_s2 + $0xc8] sm:$0xff] %v1200_v25  ;;  %v1204_v27 = vld [vmem:[%s3212_s0 + $0xd8] sm:$0xff]  ;;  %v1206_v28 = vld [vmem:[%s3212_s0 + $0xe0] sm:$0xff] }
   0xf   :  { %1203 = vst [vmem:[%s3213_s2 + $0xd0] sm:$0xff] %v1202_v26  ;;  %v1208_v29 = vld [vmem:[%s3212_s0 + $0xe8] sm:$0xff]  ;;  %1205 = vst [vmem:[%s3213_s2 + $0xd8] sm:$0xff] %v1204_v27  ;;  %v1210_v30 = vld [vmem:[%s3212_s0 + $0xf0] sm:$0xff] }
  0x10   :  { %1207 = vst [vmem:[%s3213_s2 + $0xe0] sm:$0xff] %v1206_v28  ;;  %1209 = vst [vmem:[%s3213_s2 + $0xe8] sm:$0xff] %v1208_v29  ;;  %v1212_v31 = vld [vmem:[%s3212_s0 + $0xf8] sm:$0xff]  ;;  %v1214_v32 = vld [vmem:[%s3212_s0 + $0x100] sm:$0xff] }
  0x11   :  { %1211 = vst [vmem:[%s3213_s2 + $0xf0] sm:$0xff] %v1210_v30  ;;  %1213 = vst [vmem:[%s3213_s2 + $0xf8] sm:$0xff] %v1212_v31  ;;  %v1216_v33 = vld [vmem:[%s3212_s0 + $0x108] sm:$0xff]  ;;  %v1218_v34 = vld [vmem:[%s3212_s0 + $0x110] sm:$0xff] }
  0x12   :  { %1215 = vst [vmem:[%s3213_s2 + $0x100] sm:$0xff] %v1214_v32  ;;  %v1220_v35 = vld [vmem:[%s3212_s0 + $0x118] sm:$0xff]  ;;  %1217 = vst [vmem:[%s3213_s2 + $0x108] sm:$0xff] %v1216_v33  ;;  %v1222_v36 = vld [vmem:[%s3212_s0 + $0x120] sm:$0xff] }
  0x13   :  { %1219 = vst [vmem:[%s3213_s2 + $0x110] sm:$0xff] %v1218_v34  ;;  %1221 = vst [vmem:[%s3213_s2 + $0x118] sm:$0xff] %v1220_v35  ;;  %v1224_v37 = vld [vmem:[%s3212_s0 + $0x128] sm:$0xff]  ;;  %v1226_v38 = vld [vmem:[%s3212_s0 + $0x130] sm:$0xff] }
  0x14   :  { %1223 = vst [vmem:[%s3213_s2 + $0x120] sm:$0xff] %v1222_v36  ;;  %1225 = vst [vmem:[%s3213_s2 + $0x128] sm:$0xff] %v1224_v37  ;;  %v1228_v39 = vld [vmem:[%s3212_s0 + $0x138] sm:$0xff]  ;;  %v1230_v40 = vld [vmem:[%s3212_s0 + $0x140] sm:$0xff] }
  0x15   :  { %1227 = vst [vmem:[%s3213_s2 + $0x130] sm:$0xff] %v1226_v38  ;;  %v1232_v41 = vld [vmem:[%s3212_s0 + $0x148] sm:$0xff]  ;;  %1229 = vst [vmem:[%s3213_s2 + $0x138] sm:$0xff] %v1228_v39  ;;  %v1234_v42 = vld [vmem:[%s3212_s0 + $0x150] sm:$0xff] }
  0x16   :  { %1231 = vst [vmem:[%s3213_s2 + $0x140] sm:$0xff] %v1230_v40  ;;  %1233 = vst [vmem:[%s3213_s2 + $0x148] sm:$0xff] %v1232_v41  ;;  %v1236_v43 = vld [vmem:[%s3212_s0 + $0x158] sm:$0xff]  ;;  %v1238_v44 = vld [vmem:[%s3212_s0 + $0x160] sm:$0xff] }
  0x17   :  { %1235 = vst [vmem:[%s3213_s2 + $0x150] sm:$0xff] %v1234_v42  ;;  %1237 = vst [vmem:[%s3213_s2 + $0x158] sm:$0xff] %v1236_v43  ;;  %v1240_v45 = vld [vmem:[%s3212_s0 + $0x168] sm:$0xff]  ;;  %v1242_v46 = vld [vmem:[%s3212_s0 + $0x170] sm:$0xff] }
  0x18   :  { %1239 = vst [vmem:[%s3213_s2 + $0x160] sm:$0xff] %v1238_v44  ;;  %v1244_v47 = vld [vmem:[%s3212_s0 + $0x178] sm:$0xff]  ;;  %1241 = vst [vmem:[%s3213_s2 + $0x168] sm:$0xff] %v1240_v45  ;;  %v1246_v48 = vld [vmem:[%s3212_s0 + $0x180] sm:$0xff] }
  0x19   :  { %1243 = vst [vmem:[%s3213_s2 + $0x170] sm:$0xff] %v1242_v46  ;;  %1245 = vst [vmem:[%s3213_s2 + $0x178] sm:$0xff] %v1244_v47  ;;  %v1248_v49 = vld [vmem:[%s3212_s0 + $0x188] sm:$0xff]  ;;  %v1250_v50 = vld [vmem:[%s3212_s0 + $0x190] sm:$0xff] }
  0x1a   :  { %1247 = vst [vmem:[%s3213_s2 + $0x180] sm:$0xff] %v1246_v48  ;;  %1249 = vst [vmem:[%s3213_s2 + $0x188] sm:$0xff] %v1248_v49  ;;  %v1252_v51 = vld [vmem:[%s3212_s0 + $0x198] sm:$0xff]  ;;  %v1254_v52 = vld [vmem:[%s3212_s0 + $0x1a0] sm:$0xff] }
  0x1b   :  { %1251 = vst [vmem:[%s3213_s2 + $0x190] sm:$0xff] %v1250_v50  ;;  %v1256_v53 = vld [vmem:[%s3212_s0 + $0x1a8] sm:$0xff]  ;;  %1253 = vst [vmem:[%s3213_s2 + $0x198] sm:$0xff] %v1252_v51  ;;  %v1258_v54 = vld [vmem:[%s3212_s0 + $0x1b0] sm:$0xff] }
  0x1c   :  { %1255 = vst [vmem:[%s3213_s2 + $0x1a0] sm:$0xff] %v1254_v52  ;;  %1257 = vst [vmem:[%s3213_s2 + $0x1a8] sm:$0xff] %v1256_v53  ;;  %v1260_v55 = vld [vmem:[%s3212_s0 + $0x1b8] sm:$0xff]  ;;  %v1262_v56 = vld [vmem:[%s3212_s0 + $0x1c0] sm:$0xff] }
  0x1d   :  { %1259 = vst [vmem:[%s3213_s2 + $0x1b0] sm:$0xff] %v1258_v54  ;;  %1261 = vst [vmem:[%s3213_s2 + $0x1b8] sm:$0xff] %v1260_v55  ;;  %v1264_v57 = vld [vmem:[%s3212_s0 + $0x1c8] sm:$0xff]  ;;  %v1266_v58 = vld [vmem:[%s3212_s0 + $0x1d0] sm:$0xff] }
  0x1e   :  { %1263 = vst [vmem:[%s3213_s2 + $0x1c0] sm:$0xff] %v1262_v56  ;;  %v1268_v59 = vld [vmem:[%s3212_s0 + $0x1d8] sm:$0xff]  ;;  %1265 = vst [vmem:[%s3213_s2 + $0x1c8] sm:$0xff] %v1264_v57  ;;  %v1270_v60 = vld [vmem:[%s3212_s0 + $0x1e0] sm:$0xff] }
  0x1f   :  { %1267 = vst [vmem:[%s3213_s2 + $0x1d0] sm:$0xff] %v1266_v58  ;;  %1269 = vst [vmem:[%s3213_s2 + $0x1d8] sm:$0xff] %v1268_v59  ;;  %v1272_v61 = vld [vmem:[%s3212_s0 + $0x1e8] sm:$0xff]  ;;  %v1274_v62 = vld [vmem:[%s3212_s0 + $0x1f0] sm:$0xff] }
  0x20   :  { %1271 = vst [vmem:[%s3213_s2 + $0x1e0] sm:$0xff] %v1270_v60  ;;  %1273 = vst [vmem:[%s3213_s2 + $0x1e8] sm:$0xff] %v1272_v61  ;;  %v1276_v63 = vld [vmem:[%s3212_s0 + $0x1f8] sm:$0xff]  ;;  %v1278_v0 = vld [vmem:[%s3212_s0 + $0x200] sm:$0xff] }
  0x21   :  { %1275 = vst [vmem:[%s3213_s2 + $0x1f0] sm:$0xff] %v1274_v62  ;;  %v1280_v1 = vld [vmem:[%s3212_s0 + $0x208] sm:$0xff]  ;;  %1277 = vst [vmem:[%s3213_s2 + $0x1f8] sm:$0xff] %v1276_v63  ;;  %v1282_v2 = vld [vmem:[%s3212_s0 + $0x210] sm:$0xff] }
  0x22   :  { %1279 = vst [vmem:[%s3213_s2 + $0x200] sm:$0xff] %v1278_v0  ;;  %1281 = vst [vmem:[%s3213_s2 + $0x208] sm:$0xff] %v1280_v1  ;;  %v1284_v3 = vld [vmem:[%s3212_s0 + $0x218] sm:$0xff]  ;;  %v1286_v4 = vld [vmem:[%s3212_s0 + $0x220] sm:$0xff] }
  0x23   :  { %1283 = vst [vmem:[%s3213_s2 + $0x210] sm:$0xff] %v1282_v2  ;;  %1285 = vst [vmem:[%s3213_s2 + $0x218] sm:$0xff] %v1284_v3  ;;  %v1288_v5 = vld [vmem:[%s3212_s0 + $0x228] sm:$0xff]  ;;  %v1290_v6 = vld [vmem:[%s3212_s0 + $0x230] sm:$0xff] }
  0x24   :  { %1287 = vst [vmem:[%s3213_s2 + $0x220] sm:$0xff] %v1286_v4  ;;  %v1292_v7 = vld [vmem:[%s3212_s0 + $0x238] sm:$0xff]  ;;  %1289 = vst [vmem:[%s3213_s2 + $0x228] sm:$0xff] %v1288_v5  ;;  %v1294_v8 = vld [vmem:[%s3212_s0 + $0x240] sm:$0xff] }
  0x25   :  { %1291 = vst [vmem:[%s3213_s2 + $0x230] sm:$0xff] %v1290_v6  ;;  %1293 = vst [vmem:[%s3213_s2 + $0x238] sm:$0xff] %v1292_v7  ;;  %v1296_v9 = vld [vmem:[%s3212_s0 + $0x248] sm:$0xff]  ;;  %v1298_v10 = vld [vmem:[%s3212_s0 + $0x250] sm:$0xff] }
  0x26   :  { %1295 = vst [vmem:[%s3213_s2 + $0x240] sm:$0xff] %v1294_v8  ;;  %1297 = vst [vmem:[%s3213_s2 + $0x248] sm:$0xff] %v1296_v9  ;;  %v1300_v11 = vld [vmem:[%s3212_s0 + $0x258] sm:$0xff]  ;;  %v1302_v12 = vld [vmem:[%s3212_s0 + $0x260] sm:$0xff] }
  0x27   :  { %1299 = vst [vmem:[%s3213_s2 + $0x250] sm:$0xff] %v1298_v10  ;;  %v1304_v13 = vld [vmem:[%s3212_s0 + $0x268] sm:$0xff]  ;;  %1301 = vst [vmem:[%s3213_s2 + $0x258] sm:$0xff] %v1300_v11  ;;  %v1306_v14 = vld [vmem:[%s3212_s0 + $0x270] sm:$0xff] }
  0x28   :  { %1303 = vst [vmem:[%s3213_s2 + $0x260] sm:$0xff] %v1302_v12  ;;  %1305 = vst [vmem:[%s3213_s2 + $0x268] sm:$0xff] %v1304_v13  ;;  %v1308_v15 = vld [vmem:[%s3212_s0 + $0x278] sm:$0xff]  ;;  %v1310_v16 = vld [vmem:[%s3212_s0 + $0x280] sm:$0xff] }
  0x29   :  { %1307 = vst [vmem:[%s3213_s2 + $0x270] sm:$0xff] %v1306_v14  ;;  %1309 = vst [vmem:[%s3213_s2 + $0x278] sm:$0xff] %v1308_v15  ;;  %v1312_v17 = vld [vmem:[%s3212_s0 + $0x288] sm:$0xff]  ;;  %v1314_v18 = vld [vmem:[%s3212_s0 + $0x290] sm:$0xff] }
  0x2a   :  { %1311 = vst [vmem:[%s3213_s2 + $0x280] sm:$0xff] %v1310_v16  ;;  %v1316_v19 = vld [vmem:[%s3212_s0 + $0x298] sm:$0xff]  ;;  %1313 = vst [vmem:[%s3213_s2 + $0x288] sm:$0xff] %v1312_v17  ;;  %v1318_v20 = vld [vmem:[%s3212_s0 + $0x2a0] sm:$0xff] }
  0x2b   :  { %1315 = vst [vmem:[%s3213_s2 + $0x290] sm:$0xff] %v1314_v18  ;;  %1317 = vst [vmem:[%s3213_s2 + $0x298] sm:$0xff] %v1316_v19  ;;  %v1320_v21 = vld [vmem:[%s3212_s0 + $0x2a8] sm:$0xff]  ;;  %v1322_v22 = vld [vmem:[%s3212_s0 + $0x2b0] sm:$0xff] }
  0x2c   :  { %1319 = vst [vmem:[%s3213_s2 + $0x2a0] sm:$0xff] %v1318_v20  ;;  %1321 = vst [vmem:[%s3213_s2 + $0x2a8] sm:$0xff] %v1320_v21  ;;  %v1324_v23 = vld [vmem:[%s3212_s0 + $0x2b8] sm:$0xff]  ;;  %v1326_v24 = vld [vmem:[%s3212_s0 + $0x2c0] sm:$0xff] }
  0x2d   :  { %1323 = vst [vmem:[%s3213_s2 + $0x2b0] sm:$0xff] %v1322_v22  ;;  %v1328_v25 = vld [vmem:[%s3212_s0 + $0x2c8] sm:$0xff]  ;;  %1325 = vst [vmem:[%s3213_s2 + $0x2b8] sm:$0xff] %v1324_v23  ;;  %v1330_v26 = vld [vmem:[%s3212_s0 + $0x2d0] sm:$0xff] }
  0x2e   :  { %1327 = vst [vmem:[%s3213_s2 + $0x2c0] sm:$0xff] %v1326_v24  ;;  %1329 = vst [vmem:[%s3213_s2 + $0x2c8] sm:$0xff] %v1328_v25  ;;  %v1332_v27 = vld [vmem:[%s3212_s0 + $0x2d8] sm:$0xff]  ;;  %v1334_v28 = vld [vmem:[%s3212_s0 + $0x2e0] sm:$0xff] }
  0x2f   :  { %1331 = vst [vmem:[%s3213_s2 + $0x2d0] sm:$0xff] %v1330_v26  ;;  %1333 = vst [vmem:[%s3213_s2 + $0x2d8] sm:$0xff] %v1332_v27  ;;  %v1336_v29 = vld [vmem:[%s3212_s0 + $0x2e8] sm:$0xff]  ;;  %v1338_v30 = vld [vmem:[%s3212_s0 + $0x2f0] sm:$0xff] }
  0x30   :  { %1335 = vst [vmem:[%s3213_s2 + $0x2e0] sm:$0xff] %v1334_v28  ;;  %v1340_v31 = vld [vmem:[%s3212_s0 + $0x2f8] sm:$0xff]  ;;  %1337 = vst [vmem:[%s3213_s2 + $0x2e8] sm:$0xff] %v1336_v29  ;;  %v1342_v32 = vld [vmem:[%s3212_s0 + $0x300] sm:$0xff] }
  0x31   :  { %1339 = vst [vmem:[%s3213_s2 + $0x2f0] sm:$0xff] %v1338_v30  ;;  %1341 = vst [vmem:[%s3213_s2 + $0x2f8] sm:$0xff] %v1340_v31  ;;  %v1344_v33 = vld [vmem:[%s3212_s0 + $0x308] sm:$0xff]  ;;  %v1346_v34 = vld [vmem:[%s3212_s0 + $0x310] sm:$0xff] }
  0x32   :  { %1343 = vst [vmem:[%s3213_s2 + $0x300] sm:$0xff] %v1342_v32  ;;  %1345 = vst [vmem:[%s3213_s2 + $0x308] sm:$0xff] %v1344_v33  ;;  %v1348_v35 = vld [vmem:[%s3212_s0 + $0x318] sm:$0xff]  ;;  %v1350_v36 = vld [vmem:[%s3212_s0 + $0x320] sm:$0xff] }
  0x33   :  { %1347 = vst [vmem:[%s3213_s2 + $0x310] sm:$0xff] %v1346_v34  ;;  %v1352_v37 = vld [vmem:[%s3212_s0 + $0x328] sm:$0xff]  ;;  %1349 = vst [vmem:[%s3213_s2 + $0x318] sm:$0xff] %v1348_v35  ;;  %v1354_v38 = vld [vmem:[%s3212_s0 + $0x330] sm:$0xff] }
  0x34   :  { %1351 = vst [vmem:[%s3213_s2 + $0x320] sm:$0xff] %v1350_v36  ;;  %1353 = vst [vmem:[%s3213_s2 + $0x328] sm:$0xff] %v1352_v37  ;;  %v1356_v39 = vld [vmem:[%s3212_s0 + $0x338] sm:$0xff]  ;;  %v1358_v40 = vld [vmem:[%s3212_s0 + $0x340] sm:$0xff] }
  0x35   :  { %1355 = vst [vmem:[%s3213_s2 + $0x330] sm:$0xff] %v1354_v38  ;;  %1357 = vst [vmem:[%s3213_s2 + $0x338] sm:$0xff] %v1356_v39  ;;  %v1360_v41 = vld [vmem:[%s3212_s0 + $0x348] sm:$0xff]  ;;  %v1362_v42 = vld [vmem:[%s3212_s0 + $0x350] sm:$0xff] }
  0x36   :  { %1359 = vst [vmem:[%s3213_s2 + $0x340] sm:$0xff] %v1358_v40  ;;  %v1364_v43 = vld [vmem:[%s3212_s0 + $0x358] sm:$0xff]  ;;  %1361 = vst [vmem:[%s3213_s2 + $0x348] sm:$0xff] %v1360_v41  ;;  %v1366_v44 = vld [vmem:[%s3212_s0 + $0x360] sm:$0xff] }
  0x37   :  { %1363 = vst [vmem:[%s3213_s2 + $0x350] sm:$0xff] %v1362_v42  ;;  %1365 = vst [vmem:[%s3213_s2 + $0x358] sm:$0xff] %v1364_v43  ;;  %v1368_v45 = vld [vmem:[%s3212_s0 + $0x368] sm:$0xff]  ;;  %v1370_v46 = vld [vmem:[%s3212_s0 + $0x370] sm:$0xff] }
  0x38   :  { %1367 = vst [vmem:[%s3213_s2 + $0x360] sm:$0xff] %v1366_v44  ;;  %1369 = vst [vmem:[%s3213_s2 + $0x368] sm:$0xff] %v1368_v45  ;;  %v1372_v47 = vld [vmem:[%s3212_s0 + $0x378] sm:$0xff]  ;;  %v1374_v48 = vld [vmem:[%s3212_s0 + $0x380] sm:$0xff] }
  0x39   :  { %1371 = vst [vmem:[%s3213_s2 + $0x370] sm:$0xff] %v1370_v46  ;;  %v1376_v49 = vld [vmem:[%s3212_s0 + $0x388] sm:$0xff]  ;;  %1373 = vst [vmem:[%s3213_s2 + $0x378] sm:$0xff] %v1372_v47  ;;  %v1378_v50 = vld [vmem:[%s3212_s0 + $0x390] sm:$0xff] }
  0x3a   :  { %1375 = vst [vmem:[%s3213_s2 + $0x380] sm:$0xff] %v1374_v48  ;;  %1377 = vst [vmem:[%s3213_s2 + $0x388] sm:$0xff] %v1376_v49  ;;  %v1380_v51 = vld [vmem:[%s3212_s0 + $0x398] sm:$0xff]  ;;  %v1382_v52 = vld [vmem:[%s3212_s0 + $0x3a0] sm:$0xff] }
  0x3b   :  { %1379 = vst [vmem:[%s3213_s2 + $0x390] sm:$0xff] %v1378_v50  ;;  %1381 = vst [vmem:[%s3213_s2 + $0x398] sm:$0xff] %v1380_v51  ;;  %v1384_v53 = vld [vmem:[%s3212_s0 + $0x3a8] sm:$0xff]  ;;  %v1386_v54 = vld [vmem:[%s3212_s0 + $0x3b0] sm:$0xff] }
  0x3c   :  { %1383 = vst [vmem:[%s3213_s2 + $0x3a0] sm:$0xff] %v1382_v52  ;;  %v1388_v55 = vld [vmem:[%s3212_s0 + $0x3b8] sm:$0xff]  ;;  %1385 = vst [vmem:[%s3213_s2 + $0x3a8] sm:$0xff] %v1384_v53  ;;  %v1390_v56 = vld [vmem:[%s3212_s0 + $0x3c0] sm:$0xff] }
  0x3d   :  { %1387 = vst [vmem:[%s3213_s2 + $0x3b0] sm:$0xff] %v1386_v54  ;;  %1389 = vst [vmem:[%s3213_s2 + $0x3b8] sm:$0xff] %v1388_v55  ;;  %v1392_v57 = vld [vmem:[%s3212_s0 + $0x3c8] sm:$0xff]  ;;  %v1394_v58 = vld [vmem:[%s3212_s0 + $0x3d0] sm:$0xff] }
  0x3e   :  { %1391 = vst [vmem:[%s3213_s2 + $0x3c0] sm:$0xff] %v1390_v56  ;;  %1393 = vst [vmem:[%s3213_s2 + $0x3c8] sm:$0xff] %v1392_v57  ;;  %v1396_v59 = vld [vmem:[%s3212_s0 + $0x3d8] sm:$0xff]  ;;  %v1398_v60 = vld [vmem:[%s3212_s0 + $0x3e0] sm:$0xff] }
  0x3f   :  { %1395 = vst [vmem:[%s3213_s2 + $0x3d0] sm:$0xff] %v1394_v58  ;;  %v1400_v61 = vld [vmem:[%s3212_s0 + $0x3e8] sm:$0xff]  ;;  %1397 = vst [vmem:[%s3213_s2 + $0x3d8] sm:$0xff] %v1396_v59  ;;  %v1402_v62 = vld [vmem:[%s3212_s0 + $0x3f0] sm:$0xff] }
  0x40   :  { %1399 = vst [vmem:[%s3213_s2 + $0x3e0] sm:$0xff] %v1398_v60  ;;  %1401 = vst [vmem:[%s3213_s2 + $0x3e8] sm:$0xff] %v1400_v61  ;;  %v1404_v63 = vld [vmem:[%s3212_s0 + $0x3f8] sm:$0xff]  ;;  %v515_v0 = vld [vmem:[%s3214_s1] sm:$0xff] }
  0x41   :  { %1403 = vst [vmem:[%s3213_s2 + $0x3f0] sm:$0xff] %v1402_v62  ;;  %1405 = vst [vmem:[%s3213_s2 + $0x3f8] sm:$0xff] %v1404_v63  ;;  %v1407_v1 = vld [vmem:[%s3214_s1 + $0x8] sm:$0xff]  ;;  %v1409_v2 = vld [vmem:[%s3214_s1 + $0x10] sm:$0xff] }
  0x42   :  { %1406 = vst [vmem:[%s3213_s2 + $0x400] sm:$0xff] %v515_v0  ;;  %v1411_v3 = vld [vmem:[%s3214_s1 + $0x18] sm:$0xff]  ;;  %1408 = vst [vmem:[%s3213_s2 + $0x408] sm:$0xff] %v1407_v1  ;;  %v1413_v4 = vld [vmem:[%s3214_s1 + $0x20] sm:$0xff] }
  0x43   :  { %1410 = vst [vmem:[%s3213_s2 + $0x410] sm:$0xff] %v1409_v2  ;;  %1412 = vst [vmem:[%s3213_s2 + $0x418] sm:$0xff] %v1411_v3  ;;  %v1415_v5 = vld [vmem:[%s3214_s1 + $0x28] sm:$0xff]  ;;  %v1417_v6 = vld [vmem:[%s3214_s1 + $0x30] sm:$0xff] }
  0x44   :  { %1414 = vst [vmem:[%s3213_s2 + $0x420] sm:$0xff] %v1413_v4  ;;  %1416 = vst [vmem:[%s3213_s2 + $0x428] sm:$0xff] %v1415_v5  ;;  %v1419_v7 = vld [vmem:[%s3214_s1 + $0x38] sm:$0xff]  ;;  %v1421_v8 = vld [vmem:[%s3214_s1 + $0x40] sm:$0xff] }
  0x45   :  { %1418 = vst [vmem:[%s3213_s2 + $0x430] sm:$0xff] %v1417_v6  ;;  %v1423_v9 = vld [vmem:[%s3214_s1 + $0x48] sm:$0xff]  ;;  %1420 = vst [vmem:[%s3213_s2 + $0x438] sm:$0xff] %v1419_v7  ;;  %v1425_v10 = vld [vmem:[%s3214_s1 + $0x50] sm:$0xff] }
  0x46   :  { %1422 = vst [vmem:[%s3213_s2 + $0x440] sm:$0xff] %v1421_v8  ;;  %1424 = vst [vmem:[%s3213_s2 + $0x448] sm:$0xff] %v1423_v9  ;;  %v1427_v11 = vld [vmem:[%s3214_s1 + $0x58] sm:$0xff]  ;;  %v1429_v12 = vld [vmem:[%s3214_s1 + $0x60] sm:$0xff] }
  0x47   :  { %1426 = vst [vmem:[%s3213_s2 + $0x450] sm:$0xff] %v1425_v10  ;;  %1428 = vst [vmem:[%s3213_s2 + $0x458] sm:$0xff] %v1427_v11  ;;  %v1431_v13 = vld [vmem:[%s3214_s1 + $0x68] sm:$0xff]  ;;  %v1433_v14 = vld [vmem:[%s3214_s1 + $0x70] sm:$0xff] }
  0x48   :  { %1430 = vst [vmem:[%s3213_s2 + $0x460] sm:$0xff] %v1429_v12  ;;  %v1435_v15 = vld [vmem:[%s3214_s1 + $0x78] sm:$0xff]  ;;  %1432 = vst [vmem:[%s3213_s2 + $0x468] sm:$0xff] %v1431_v13  ;;  %v1437_v16 = vld [vmem:[%s3214_s1 + $0x80] sm:$0xff] }
  0x49   :  { %1434 = vst [vmem:[%s3213_s2 + $0x470] sm:$0xff] %v1433_v14  ;;  %1436 = vst [vmem:[%s3213_s2 + $0x478] sm:$0xff] %v1435_v15  ;;  %v1439_v17 = vld [vmem:[%s3214_s1 + $0x88] sm:$0xff]  ;;  %v1441_v18 = vld [vmem:[%s3214_s1 + $0x90] sm:$0xff] }
  0x4a   :  { %1438 = vst [vmem:[%s3213_s2 + $0x480] sm:$0xff] %v1437_v16  ;;  %1440 = vst [vmem:[%s3213_s2 + $0x488] sm:$0xff] %v1439_v17  ;;  %v1443_v19 = vld [vmem:[%s3214_s1 + $0x98] sm:$0xff]  ;;  %v1445_v20 = vld [vmem:[%s3214_s1 + $0xa0] sm:$0xff] }
  0x4b   :  { %1442 = vst [vmem:[%s3213_s2 + $0x490] sm:$0xff] %v1441_v18  ;;  %v1447_v21 = vld [vmem:[%s3214_s1 + $0xa8] sm:$0xff]  ;;  %1444 = vst [vmem:[%s3213_s2 + $0x498] sm:$0xff] %v1443_v19  ;;  %v1449_v22 = vld [vmem:[%s3214_s1 + $0xb0] sm:$0xff] }
  0x4c   :  { %1446 = vst [vmem:[%s3213_s2 + $0x4a0] sm:$0xff] %v1445_v20  ;;  %1448 = vst [vmem:[%s3213_s2 + $0x4a8] sm:$0xff] %v1447_v21  ;;  %v1451_v23 = vld [vmem:[%s3214_s1 + $0xb8] sm:$0xff]  ;;  %v1453_v24 = vld [vmem:[%s3214_s1 + $0xc0] sm:$0xff] }
  0x4d   :  { %1450 = vst [vmem:[%s3213_s2 + $0x4b0] sm:$0xff] %v1449_v22  ;;  %1452 = vst [vmem:[%s3213_s2 + $0x4b8] sm:$0xff] %v1451_v23  ;;  %v1455_v25 = vld [vmem:[%s3214_s1 + $0xc8] sm:$0xff]  ;;  %v1457_v26 = vld [vmem:[%s3214_s1 + $0xd0] sm:$0xff] }
  0x4e   :  { %1454 = vst [vmem:[%s3213_s2 + $0x4c0] sm:$0xff] %v1453_v24  ;;  %v1459_v27 = vld [vmem:[%s3214_s1 + $0xd8] sm:$0xff]  ;;  %1456 = vst [vmem:[%s3213_s2 + $0x4c8] sm:$0xff] %v1455_v25  ;;  %v1461_v28 = vld [vmem:[%s3214_s1 + $0xe0] sm:$0xff] }
  0x4f   :  { %1458 = vst [vmem:[%s3213_s2 + $0x4d0] sm:$0xff] %v1457_v26  ;;  %1460 = vst [vmem:[%s3213_s2 + $0x4d8] sm:$0xff] %v1459_v27  ;;  %v1463_v29 = vld [vmem:[%s3214_s1 + $0xe8] sm:$0xff]  ;;  %v1465_v30 = vld [vmem:[%s3214_s1 + $0xf0] sm:$0xff] }
  0x50   :  { %1462 = vst [vmem:[%s3213_s2 + $0x4e0] sm:$0xff] %v1461_v28  ;;  %1464 = vst [vmem:[%s3213_s2 + $0x4e8] sm:$0xff] %v1463_v29  ;;  %v1467_v31 = vld [vmem:[%s3214_s1 + $0xf8] sm:$0xff]  ;;  %v1469_v32 = vld [vmem:[%s3214_s1 + $0x100] sm:$0xff] }
  0x51   :  { %1466 = vst [vmem:[%s3213_s2 + $0x4f0] sm:$0xff] %v1465_v30  ;;  %v1471_v33 = vld [vmem:[%s3214_s1 + $0x108] sm:$0xff]  ;;  %1468 = vst [vmem:[%s3213_s2 + $0x4f8] sm:$0xff] %v1467_v31  ;;  %v1473_v34 = vld [vmem:[%s3214_s1 + $0x110] sm:$0xff] }
  0x52   :  { %1470 = vst [vmem:[%s3213_s2 + $0x500] sm:$0xff] %v1469_v32  ;;  %1472 = vst [vmem:[%s3213_s2 + $0x508] sm:$0xff] %v1471_v33  ;;  %v1475_v35 = vld [vmem:[%s3214_s1 + $0x118] sm:$0xff]  ;;  %v1477_v36 = vld [vmem:[%s3214_s1 + $0x120] sm:$0xff] }
  0x53   :  { %1474 = vst [vmem:[%s3213_s2 + $0x510] sm:$0xff] %v1473_v34  ;;  %1476 = vst [vmem:[%s3213_s2 + $0x518] sm:$0xff] %v1475_v35  ;;  %v1479_v37 = vld [vmem:[%s3214_s1 + $0x128] sm:$0xff]  ;;  %v1481_v38 = vld [vmem:[%s3214_s1 + $0x130] sm:$0xff] }
  0x54   :  { %1478 = vst [vmem:[%s3213_s2 + $0x520] sm:$0xff] %v1477_v36  ;;  %v1483_v39 = vld [vmem:[%s3214_s1 + $0x138] sm:$0xff]  ;;  %1480 = vst [vmem:[%s3213_s2 + $0x528] sm:$0xff] %v1479_v37  ;;  %v1485_v40 = vld [vmem:[%s3214_s1 + $0x140] sm:$0xff] }
  0x55   :  { %1482 = vst [vmem:[%s3213_s2 + $0x530] sm:$0xff] %v1481_v38  ;;  %1484 = vst [vmem:[%s3213_s2 + $0x538] sm:$0xff] %v1483_v39  ;;  %v1487_v41 = vld [vmem:[%s3214_s1 + $0x148] sm:$0xff]  ;;  %v1489_v42 = vld [vmem:[%s3214_s1 + $0x150] sm:$0xff] }
  0x56   :  { %1486 = vst [vmem:[%s3213_s2 + $0x540] sm:$0xff] %v1485_v40  ;;  %1488 = vst [vmem:[%s3213_s2 + $0x548] sm:$0xff] %v1487_v41  ;;  %v1491_v43 = vld [vmem:[%s3214_s1 + $0x158] sm:$0xff]  ;;  %v1493_v44 = vld [vmem:[%s3214_s1 + $0x160] sm:$0xff] }
  0x57   :  { %1490 = vst [vmem:[%s3213_s2 + $0x550] sm:$0xff] %v1489_v42  ;;  %v1495_v45 = vld [vmem:[%s3214_s1 + $0x168] sm:$0xff]  ;;  %1492 = vst [vmem:[%s3213_s2 + $0x558] sm:$0xff] %v1491_v43  ;;  %v1497_v46 = vld [vmem:[%s3214_s1 + $0x170] sm:$0xff] }
  0x58   :  { %1494 = vst [vmem:[%s3213_s2 + $0x560] sm:$0xff] %v1493_v44  ;;  %1496 = vst [vmem:[%s3213_s2 + $0x568] sm:$0xff] %v1495_v45  ;;  %v1499_v47 = vld [vmem:[%s3214_s1 + $0x178] sm:$0xff]  ;;  %v1501_v48 = vld [vmem:[%s3214_s1 + $0x180] sm:$0xff] }
  0x59   :  { %1498 = vst [vmem:[%s3213_s2 + $0x570] sm:$0xff] %v1497_v46  ;;  %1500 = vst [vmem:[%s3213_s2 + $0x578] sm:$0xff] %v1499_v47  ;;  %v1503_v49 = vld [vmem:[%s3214_s1 + $0x188] sm:$0xff]  ;;  %v1505_v50 = vld [vmem:[%s3214_s1 + $0x190] sm:$0xff] }
  0x5a   :  { %1502 = vst [vmem:[%s3213_s2 + $0x580] sm:$0xff] %v1501_v48  ;;  %v1507_v51 = vld [vmem:[%s3214_s1 + $0x198] sm:$0xff]  ;;  %1504 = vst [vmem:[%s3213_s2 + $0x588] sm:$0xff] %v1503_v49  ;;  %v1509_v52 = vld [vmem:[%s3214_s1 + $0x1a0] sm:$0xff] }
  0x5b   :  { %1506 = vst [vmem:[%s3213_s2 + $0x590] sm:$0xff] %v1505_v50  ;;  %1508 = vst [vmem:[%s3213_s2 + $0x598] sm:$0xff] %v1507_v51  ;;  %v1511_v53 = vld [vmem:[%s3214_s1 + $0x1a8] sm:$0xff]  ;;  %v1513_v54 = vld [vmem:[%s3214_s1 + $0x1b0] sm:$0xff] }
  0x5c   :  { %1510 = vst [vmem:[%s3213_s2 + $0x5a0] sm:$0xff] %v1509_v52  ;;  %1512 = vst [vmem:[%s3213_s2 + $0x5a8] sm:$0xff] %v1511_v53  ;;  %v1515_v55 = vld [vmem:[%s3214_s1 + $0x1b8] sm:$0xff]  ;;  %v1517_v56 = vld [vmem:[%s3214_s1 + $0x1c0] sm:$0xff] }
  0x5d   :  { %1514 = vst [vmem:[%s3213_s2 + $0x5b0] sm:$0xff] %v1513_v54  ;;  %v1519_v57 = vld [vmem:[%s3214_s1 + $0x1c8] sm:$0xff]  ;;  %1516 = vst [vmem:[%s3213_s2 + $0x5b8] sm:$0xff] %v1515_v55  ;;  %v1521_v58 = vld [vmem:[%s3214_s1 + $0x1d0] sm:$0xff] }
  0x5e   :  { %1518 = vst [vmem:[%s3213_s2 + $0x5c0] sm:$0xff] %v1517_v56  ;;  %1520 = vst [vmem:[%s3213_s2 + $0x5c8] sm:$0xff] %v1519_v57  ;;  %v1523_v59 = vld [vmem:[%s3214_s1 + $0x1d8] sm:$0xff]  ;;  %v1525_v60 = vld [vmem:[%s3214_s1 + $0x1e0] sm:$0xff] }
  0x5f   :  { %1522 = vst [vmem:[%s3213_s2 + $0x5d0] sm:$0xff] %v1521_v58  ;;  %1524 = vst [vmem:[%s3213_s2 + $0x5d8] sm:$0xff] %v1523_v59  ;;  %v1527_v61 = vld [vmem:[%s3214_s1 + $0x1e8] sm:$0xff]  ;;  %v1529_v62 = vld [vmem:[%s3214_s1 + $0x1f0] sm:$0xff] }
  0x60   :  { %1526 = vst [vmem:[%s3213_s2 + $0x5e0] sm:$0xff] %v1525_v60  ;;  %v1531_v63 = vld [vmem:[%s3214_s1 + $0x1f8] sm:$0xff]  ;;  %1528 = vst [vmem:[%s3213_s2 + $0x5e8] sm:$0xff] %v1527_v61  ;;  %v1533_v0 = vld [vmem:[%s3214_s1 + $0x200] sm:$0xff] }
  0x61   :  { %1530 = vst [vmem:[%s3213_s2 + $0x5f0] sm:$0xff] %v1529_v62  ;;  %1532 = vst [vmem:[%s3213_s2 + $0x5f8] sm:$0xff] %v1531_v63  ;;  %v1535_v1 = vld [vmem:[%s3214_s1 + $0x208] sm:$0xff]  ;;  %v1537_v2 = vld [vmem:[%s3214_s1 + $0x210] sm:$0xff] }
  0x62   :  { %1534 = vst [vmem:[%s3213_s2 + $0x600] sm:$0xff] %v1533_v0  ;;  %1536 = vst [vmem:[%s3213_s2 + $0x608] sm:$0xff] %v1535_v1  ;;  %v1539_v3 = vld [vmem:[%s3214_s1 + $0x218] sm:$0xff]  ;;  %v1541_v4 = vld [vmem:[%s3214_s1 + $0x220] sm:$0xff] }
  0x63   :  { %1538 = vst [vmem:[%s3213_s2 + $0x610] sm:$0xff] %v1537_v2  ;;  %v1543_v5 = vld [vmem:[%s3214_s1 + $0x228] sm:$0xff]  ;;  %1540 = vst [vmem:[%s3213_s2 + $0x618] sm:$0xff] %v1539_v3  ;;  %v1545_v6 = vld [vmem:[%s3214_s1 + $0x230] sm:$0xff] }
  0x64   :  { %1542 = vst [vmem:[%s3213_s2 + $0x620] sm:$0xff] %v1541_v4  ;;  %1544 = vst [vmem:[%s3213_s2 + $0x628] sm:$0xff] %v1543_v5  ;;  %v1547_v7 = vld [vmem:[%s3214_s1 + $0x238] sm:$0xff]  ;;  %v1549_v8 = vld [vmem:[%s3214_s1 + $0x240] sm:$0xff] }
  0x65   :  { %1546 = vst [vmem:[%s3213_s2 + $0x630] sm:$0xff] %v1545_v6  ;;  %1548 = vst [vmem:[%s3213_s2 + $0x638] sm:$0xff] %v1547_v7  ;;  %v1551_v9 = vld [vmem:[%s3214_s1 + $0x248] sm:$0xff]  ;;  %v1553_v10 = vld [vmem:[%s3214_s1 + $0x250] sm:$0xff] }
  0x66   :  { %1550 = vst [vmem:[%s3213_s2 + $0x640] sm:$0xff] %v1549_v8  ;;  %v1555_v11 = vld [vmem:[%s3214_s1 + $0x258] sm:$0xff]  ;;  %1552 = vst [vmem:[%s3213_s2 + $0x648] sm:$0xff] %v1551_v9  ;;  %v1557_v12 = vld [vmem:[%s3214_s1 + $0x260] sm:$0xff] }
  0x67   :  { %1554 = vst [vmem:[%s3213_s2 + $0x650] sm:$0xff] %v1553_v10  ;;  %1556 = vst [vmem:[%s3213_s2 + $0x658] sm:$0xff] %v1555_v11  ;;  %v1559_v13 = vld [vmem:[%s3214_s1 + $0x268] sm:$0xff]  ;;  %v1561_v14 = vld [vmem:[%s3214_s1 + $0x270] sm:$0xff] }
  0x68   :  { %1558 = vst [vmem:[%s3213_s2 + $0x660] sm:$0xff] %v1557_v12  ;;  %1560 = vst [vmem:[%s3213_s2 + $0x668] sm:$0xff] %v1559_v13  ;;  %v1563_v15 = vld [vmem:[%s3214_s1 + $0x278] sm:$0xff]  ;;  %v1565_v16 = vld [vmem:[%s3214_s1 + $0x280] sm:$0xff] }
  0x69   :  { %1562 = vst [vmem:[%s3213_s2 + $0x670] sm:$0xff] %v1561_v14  ;;  %v1567_v17 = vld [vmem:[%s3214_s1 + $0x288] sm:$0xff]  ;;  %1564 = vst [vmem:[%s3213_s2 + $0x678] sm:$0xff] %v1563_v15  ;;  %v1569_v18 = vld [vmem:[%s3214_s1 + $0x290] sm:$0xff] }
  0x6a   :  { %1566 = vst [vmem:[%s3213_s2 + $0x680] sm:$0xff] %v1565_v16  ;;  %1568 = vst [vmem:[%s3213_s2 + $0x688] sm:$0xff] %v1567_v17  ;;  %v1571_v19 = vld [vmem:[%s3214_s1 + $0x298] sm:$0xff]  ;;  %v1573_v20 = vld [vmem:[%s3214_s1 + $0x2a0] sm:$0xff] }
  0x6b   :  { %1570 = vst [vmem:[%s3213_s2 + $0x690] sm:$0xff] %v1569_v18  ;;  %1572 = vst [vmem:[%s3213_s2 + $0x698] sm:$0xff] %v1571_v19  ;;  %v1575_v21 = vld [vmem:[%s3214_s1 + $0x2a8] sm:$0xff]  ;;  %v1577_v22 = vld [vmem:[%s3214_s1 + $0x2b0] sm:$0xff] }
  0x6c   :  { %1574 = vst [vmem:[%s3213_s2 + $0x6a0] sm:$0xff] %v1573_v20  ;;  %v1579_v23 = vld [vmem:[%s3214_s1 + $0x2b8] sm:$0xff]  ;;  %1576 = vst [vmem:[%s3213_s2 + $0x6a8] sm:$0xff] %v1575_v21  ;;  %v1581_v24 = vld [vmem:[%s3214_s1 + $0x2c0] sm:$0xff] }
  0x6d   :  { %1578 = vst [vmem:[%s3213_s2 + $0x6b0] sm:$0xff] %v1577_v22  ;;  %1580 = vst [vmem:[%s3213_s2 + $0x6b8] sm:$0xff] %v1579_v23  ;;  %v1583_v25 = vld [vmem:[%s3214_s1 + $0x2c8] sm:$0xff]  ;;  %v1585_v26 = vld [vmem:[%s3214_s1 + $0x2d0] sm:$0xff] }
  0x6e   :  { %1582 = vst [vmem:[%s3213_s2 + $0x6c0] sm:$0xff] %v1581_v24  ;;  %1584 = vst [vmem:[%s3213_s2 + $0x6c8] sm:$0xff] %v1583_v25  ;;  %v1587_v27 = vld [vmem:[%s3214_s1 + $0x2d8] sm:$0xff]  ;;  %v1589_v28 = vld [vmem:[%s3214_s1 + $0x2e0] sm:$0xff] }
  0x6f   :  { %1586 = vst [vmem:[%s3213_s2 + $0x6d0] sm:$0xff] %v1585_v26  ;;  %v1591_v29 = vld [vmem:[%s3214_s1 + $0x2e8] sm:$0xff]  ;;  %1588 = vst [vmem:[%s3213_s2 + $0x6d8] sm:$0xff] %v1587_v27  ;;  %v1593_v30 = vld [vmem:[%s3214_s1 + $0x2f0] sm:$0xff] }
  0x70   :  { %1590 = vst [vmem:[%s3213_s2 + $0x6e0] sm:$0xff] %v1589_v28  ;;  %1592 = vst [vmem:[%s3213_s2 + $0x6e8] sm:$0xff] %v1591_v29  ;;  %v1595_v31 = vld [vmem:[%s3214_s1 + $0x2f8] sm:$0xff]  ;;  %v1597_v32 = vld [vmem:[%s3214_s1 + $0x300] sm:$0xff] }
  0x71   :  { %1594 = vst [vmem:[%s3213_s2 + $0x6f0] sm:$0xff] %v1593_v30  ;;  %1596 = vst [vmem:[%s3213_s2 + $0x6f8] sm:$0xff] %v1595_v31  ;;  %v1599_v33 = vld [vmem:[%s3214_s1 + $0x308] sm:$0xff]  ;;  %v1601_v34 = vld [vmem:[%s3214_s1 + $0x310] sm:$0xff] }
  0x72   :  { %1598 = vst [vmem:[%s3213_s2 + $0x700] sm:$0xff] %v1597_v32  ;;  %v1603_v35 = vld [vmem:[%s3214_s1 + $0x318] sm:$0xff]  ;;  %1600 = vst [vmem:[%s3213_s2 + $0x708] sm:$0xff] %v1599_v33  ;;  %v1605_v36 = vld [vmem:[%s3214_s1 + $0x320] sm:$0xff] }
  0x73   :  { %1602 = vst [vmem:[%s3213_s2 + $0x710] sm:$0xff] %v1601_v34  ;;  %1604 = vst [vmem:[%s3213_s2 + $0x718] sm:$0xff] %v1603_v35  ;;  %v1607_v37 = vld [vmem:[%s3214_s1 + $0x328] sm:$0xff]  ;;  %v1609_v38 = vld [vmem:[%s3214_s1 + $0x330] sm:$0xff] }
  0x74   :  { %1606 = vst [vmem:[%s3213_s2 + $0x720] sm:$0xff] %v1605_v36  ;;  %1608 = vst [vmem:[%s3213_s2 + $0x728] sm:$0xff] %v1607_v37  ;;  %v1611_v39 = vld [vmem:[%s3214_s1 + $0x338] sm:$0xff]  ;;  %v1613_v40 = vld [vmem:[%s3214_s1 + $0x340] sm:$0xff] }
  0x75   :  { %1610 = vst [vmem:[%s3213_s2 + $0x730] sm:$0xff] %v1609_v38  ;;  %v1615_v41 = vld [vmem:[%s3214_s1 + $0x348] sm:$0xff]  ;;  %1612 = vst [vmem:[%s3213_s2 + $0x738] sm:$0xff] %v1611_v39  ;;  %v1617_v42 = vld [vmem:[%s3214_s1 + $0x350] sm:$0xff] }
  0x76   :  { %1614 = vst [vmem:[%s3213_s2 + $0x740] sm:$0xff] %v1613_v40  ;;  %1616 = vst [vmem:[%s3213_s2 + $0x748] sm:$0xff] %v1615_v41  ;;  %v1619_v43 = vld [vmem:[%s3214_s1 + $0x358] sm:$0xff]  ;;  %v1621_v44 = vld [vmem:[%s3214_s1 + $0x360] sm:$0xff] }
  0x77   :  { %1618 = vst [vmem:[%s3213_s2 + $0x750] sm:$0xff] %v1617_v42  ;;  %1620 = vst [vmem:[%s3213_s2 + $0x758] sm:$0xff] %v1619_v43  ;;  %v1623_v45 = vld [vmem:[%s3214_s1 + $0x368] sm:$0xff]  ;;  %v1625_v46 = vld [vmem:[%s3214_s1 + $0x370] sm:$0xff] }
  0x78   :  { %1622 = vst [vmem:[%s3213_s2 + $0x760] sm:$0xff] %v1621_v44  ;;  %v1627_v47 = vld [vmem:[%s3214_s1 + $0x378] sm:$0xff]  ;;  %1624 = vst [vmem:[%s3213_s2 + $0x768] sm:$0xff] %v1623_v45  ;;  %v1629_v48 = vld [vmem:[%s3214_s1 + $0x380] sm:$0xff] }
  0x79   :  { %1626 = vst [vmem:[%s3213_s2 + $0x770] sm:$0xff] %v1625_v46  ;;  %1628 = vst [vmem:[%s3213_s2 + $0x778] sm:$0xff] %v1627_v47  ;;  %v1631_v49 = vld [vmem:[%s3214_s1 + $0x388] sm:$0xff]  ;;  %v1633_v50 = vld [vmem:[%s3214_s1 + $0x390] sm:$0xff] }
  0x7a   :  { %1630 = vst [vmem:[%s3213_s2 + $0x780] sm:$0xff] %v1629_v48  ;;  %1632 = vst [vmem:[%s3213_s2 + $0x788] sm:$0xff] %v1631_v49  ;;  %v1635_v51 = vld [vmem:[%s3214_s1 + $0x398] sm:$0xff]  ;;  %v1637_v52 = vld [vmem:[%s3214_s1 + $0x3a0] sm:$0xff] }
  0x7b   :  { %1634 = vst [vmem:[%s3213_s2 + $0x790] sm:$0xff] %v1633_v50  ;;  %v1639_v53 = vld [vmem:[%s3214_s1 + $0x3a8] sm:$0xff]  ;;  %1636 = vst [vmem:[%s3213_s2 + $0x798] sm:$0xff] %v1635_v51  ;;  %v1641_v54 = vld [vmem:[%s3214_s1 + $0x3b0] sm:$0xff] }
  0x7c   :  { %1638 = vst [vmem:[%s3213_s2 + $0x7a0] sm:$0xff] %v1637_v52  ;;  %1640 = vst [vmem:[%s3213_s2 + $0x7a8] sm:$0xff] %v1639_v53  ;;  %v1643_v55 = vld [vmem:[%s3214_s1 + $0x3b8] sm:$0xff]  ;;  %v1645_v56 = vld [vmem:[%s3214_s1 + $0x3c0] sm:$0xff] }
  0x7d   :  { %1642 = vst [vmem:[%s3213_s2 + $0x7b0] sm:$0xff] %v1641_v54  ;;  %1644 = vst [vmem:[%s3213_s2 + $0x7b8] sm:$0xff] %v1643_v55  ;;  %v1647_v57 = vld [vmem:[%s3214_s1 + $0x3c8] sm:$0xff]  ;;  %v1649_v58 = vld [vmem:[%s3214_s1 + $0x3d0] sm:$0xff] }
  0x7e   :  { %1646 = vst [vmem:[%s3213_s2 + $0x7c0] sm:$0xff] %v1645_v56  ;;  %v1651_v59 = vld [vmem:[%s3214_s1 + $0x3d8] sm:$0xff]  ;;  %1648 = vst [vmem:[%s3213_s2 + $0x7c8] sm:$0xff] %v1647_v57  ;;  %v1653_v60 = vld [vmem:[%s3214_s1 + $0x3e0] sm:$0xff] }
  0x7f   :  { %1650 = vst [vmem:[%s3213_s2 + $0x7d0] sm:$0xff] %v1649_v58  ;;  %1652 = vst [vmem:[%s3213_s2 + $0x7d8] sm:$0xff] %v1651_v59  ;;  %v1655_v61 = vld [vmem:[%s3214_s1 + $0x3e8] sm:$0xff]  ;;  %v1657_v62 = vld [vmem:[%s3214_s1 + $0x3f0] sm:$0xff] }
  0x80   :  { %1654 = vst [vmem:[%s3213_s2 + $0x7e0] sm:$0xff] %v1653_v60  ;;  %1656 = vst [vmem:[%s3213_s2 + $0x7e8] sm:$0xff] %v1655_v61  ;;  %v1659_v63 = vld [vmem:[%s3214_s1 + $0x3f8] sm:$0xff] }
  0x81   :  { %1658 = vst [vmem:[%s3213_s2 + $0x7f0] sm:$0xff] %v1657_v62  ;;  %1660 = vst [vmem:[%s3213_s2 + $0x7f8] sm:$0xff] %v1659_v63 }

</bundles_post_ra>
